<compile_context>
chip_gen: v5e
topology: v5e:2x2
jax: 0.10.0
libtpu: 0.0.40
codegen_flags: <defaults>
</compile_context>

<pallas_src>
import functools

import jax
import jax.numpy as jnp
import numpy as np
from jax.experimental import pallas as pl
from jax.experimental.pallas import tpu as pltpu

_SMALL_HW = 512            # below this, pack the batch onto the lane axis
_VMEM_LIMIT = 32 << 20     # explicit scoped-VMEM limit (safe on v5e/v6e/v7x)
_SLAB_BUDGET = 16 << 20    # double-buffered x + out streaming slabs
_LANE_CAP = 32768          # max lanes per tile (keeps stores unmasked & cheap)


def _ds_block_kernel(x_ref, w1_ref, b1_ref, w2_ref, b2_ref, o_ref, *, num_classes):
    # x_ref:  (C, tile_hw)       pixel slab (channels on sublanes, pixels on lanes), f32 or bf16
    # w1_ref: (Cmid, C)          conv1 1x1 weight with BN scale folded in (same dtype as x)
    # b1_ref: (Cmid, 1)          folded BN bias (f32)
    # w2_ref: (Cmid, ncls)       classifier 1x1 weight, transposed (f32)
    # b2_ref: (ncls, 1)          classifier bias (f32)
    # o_ref:  (ncls, tile_hw)    lane-dense output slab (same dtype as x)
    x = x_ref[...]
    h = jnp.dot(w1_ref[...], x, preferred_element_type=jnp.float32)      # (Cmid, tile_hw) f32 acc
    h = jnp.maximum(h + b1_ref[...], 0.0)                                 # bias + ReLU in f32
    # attention_name=None -> identity
    if num_classes == 1:
        # Skip the N=1 MXU matmul: broadcast-multiply (VPU) + sublane reduce (XLU).
        o = jnp.sum(h * w2_ref[...], axis=0, keepdims=True) + b2_ref[...]
    else:
        # (ncls, tile_hw) = w2^T @ h, contracting the Cmid axis.
        o = jax.lax.dot_general(w2_ref[...], h, (((0,), (0,)), ((), ())),
                                preferred_element_type=jnp.float32) + b2_ref[...]
    o_ref[...] = o.astype(o_ref.dtype)


def _pick_tile_hw(hw, n, c, ncls, x_itemsize, out_itemsize, weight_bytes):
    """Largest lane tile fitting the double-buffered slab budget, with >=2 grid points when possible."""
    budget = max(_SLAB_BUDGET - 2 * weight_bytes, 1 << 20)   # weights are double-buffered too
    per_px = (c * x_itemsize + max(ncls, 1) * out_itemsize) * 2   # x2 for double buffering
    cap = min(_LANE_CAP, max(128, (budget // per_px) // 128 * 128))
    tile = hw if hw <= cap else cap                  # full-dim block is legal; else 128-multiple
    # v7x megacore: guarantee >=2 points across the "parallel" grid axes when feasible.
    if n * pl.cdiv(hw, tile) < 2 and hw >= 256:
        tile = ((pl.cdiv(hw, 2) + 127) // 128) * 128
    return tile


@functools.partial(jax.jit, static_argnames=("num_classes",))
def ds_block_apply(feat_nchw, w1, bn_gamma, bn_beta, bn_mean, bn_var, w2, b2,
                   num_classes=1):
    """Apply one DeepSupervisionBlock to an NCHW feature map (eval-mode BN)."""
    n, c, h, w = feat_nchw.shape
    cmid = w1.shape[0]
    eps = 1e-5
    hw = h * w

    x_dtype = feat_nchw.dtype
    compute_dtype = jnp.bfloat16 if x_dtype == jnp.bfloat16 else jnp.float32

    # Fold eval-mode BatchNorm into the 1x1 conv weight + per-channel bias.
    scale = bn_gamma.astype(jnp.float32) / jnp.sqrt(bn_var.astype(jnp.float32) + eps)
    w1_folded = (w1.astype(jnp.float32) * scale[:, None]).astype(compute_dtype)   # (Cmid, C)
    b1 = (bn_beta.astype(jnp.float32) - bn_mean.astype(jnp.float32) * scale).reshape(cmid, 1)
    w2_t = jnp.transpose(w2, (1, 0)).astype(jnp.float32)                           # (Cmid, ncls)
    b2_c = b2.astype(jnp.float32).reshape(num_classes, 1)

    # Small-HW: pack batch onto lanes -> lane-dense vregs & stores. Transposing these tiny
    # arrays in XLA is noise compared with per-step / per-call overhead.
    packed = (hw < _SMALL_HW) and (n > 1)
    if packed:
        x = jnp.transpose(feat_nchw.reshape(n, c, hw), (1, 0, 2)).reshape(1, c, n * hw)
        n_eff, hw_eff = 1, n * hw
    else:
        # NCHW -> (N, C, HW): a free reshape, no transpose / extra HBM traffic.
        x = feat_nchw.reshape(n, c, hw)
        n_eff, hw_eff = n, hw

    x_itemsize = np.dtype(x_dtype).itemsize
    out_itemsize = x_itemsize
    weight_bytes = (cmid * c * np.dtype(compute_dtype).itemsize
                    + cmid * 4 + cmid * num_classes * 4 + num_classes * 4)
    tile_hw = _pick_tile_hw(hw_eff, n_eff, c, num_classes,
                            x_itemsize, out_itemsize, weight_bytes)
    grid = (n_eff, pl.cdiv(hw_eff, tile_hw))

    kernel = functools.partial(_ds_block_kernel, num_classes=num_classes)

    flops = 2 * n * hw * (c * cmid + cmid * num_classes)
    bytes_accessed = (x_itemsize * n * hw * c
                      + out_itemsize * n * hw * num_classes
                      + weight_bytes)

    out = pl.pallas_call(
        kernel,
        out_shape=jax.ShapeDtypeStruct((n_eff, num_classes, hw_eff), x_dtype),
        grid_spec=pltpu.PrefetchScalarGridSpec(
            num_scalar_prefetch=0,
            grid=grid,
            in_specs=[
                pl.BlockSpec((None, c, tile_hw), lambda b, j: (b, 0, j)),
                pl.BlockSpec((cmid, c), lambda b, j: (0, 0)),
                pl.BlockSpec((cmid, 1), lambda b, j: (0, 0)),
                pl.BlockSpec((cmid, num_classes), lambda b, j: (0, 0)),
                pl.BlockSpec((num_classes, 1), lambda b, j: (0, 0)),
            ],
            out_specs=pl.BlockSpec((None, num_classes, tile_hw),
                                   lambda b, j: (b, 0, j)),
        ),
        compiler_params=pltpu.CompilerParams(
            dimension_semantics=("parallel", "parallel"),
            vmem_limit_bytes=_VMEM_LIMIT),
        cost_estimate=pl.CostEstimate(flops=flops, transcendentals=0,
                                      bytes_accessed=bytes_accessed),
    )(x, w1_folded, b1, w2_t, b2_c)

    if packed:
        # (1, ncls, N*HW) -> (ncls, N, HW) -> (N, ncls, HW)
        out = jnp.transpose(out.reshape(num_classes, n, hw), (1, 0, 2))
    return out.reshape(n, num_classes, h, w)


def init_block_params(key, in_channels, num_classes=1):
    cmid = in_channels // 4
    k1, k2, k3, k4, k5 = jax.random.split(key, 5)
    w1 = jax.random.normal(k1, (cmid, in_channels), jnp.float32) * 0.1   # conv1 1x1, bias=False
    bn_gamma = 1.0 + 0.05 * jax.random.normal(k2, (cmid,), jnp.float32)
    bn_beta = 0.05 * jax.random.normal(k3, (cmid,), jnp.float32)
    bn_mean = jnp.zeros((cmid,), jnp.float32)
    bn_var = jnp.ones((cmid,), jnp.float32)
    w2 = jax.random.normal(k4, (num_classes, cmid), jnp.float32) * 0.1   # cls conv 1x1
    b2 = 0.05 * jax.random.normal(k5, (num_classes,), jnp.float32)
    return dict(w1=w1, bn_gamma=bn_gamma, bn_beta=bn_beta,
                bn_mean=bn_mean, bn_var=bn_var, w2=w2, b2=b2)


@functools.partial(jax.jit, static_argnames=("num_classes",))
def deep_supervision_head(features, blocks_params, num_classes=1):
    """features: list of NCHW arrays (encoder order, shallow->deep).
    Applies one block per feature in features[::-1][:3]; all 3 pallas_calls are co-scheduled
    under this single jit to amortize dispatch overhead. Returns list of 3 NCHW logits."""
    outs = []
    for idx, feat in enumerate(features[::-1][:3]):
        p = blocks_params[idx]
        outs.append(ds_block_apply(feat, p["w1"], p["bn_gamma"], p["bn_beta"],
                                   p["bn_mean"], p["bn_var"], p["w2"], p["b2"],
                                   num_classes=num_classes))
    return outs


def _reference_block(feat, p, num_classes=1):
    # pure-JAX reference for correctness check (f32)
    eps = 1e-5
    n, c, h, w = feat.shape
    x = jnp.transpose(feat.astype(jnp.float32), (0, 2, 3, 1)).reshape(-1, c)
    scale = p["bn_gamma"] / jnp.sqrt(p["bn_var"] + eps)
    bias = p["bn_beta"] - p["bn_mean"] * scale
    hmid = jnp.maximum(x @ p["w1"].T * scale + bias, 0.0)
    o = hmid @ p["w2"].T + p["b2"]
    return jnp.transpose(o.reshape(n, h, w, num_classes), (0, 3, 1, 2))


if __name__ == "__main__":
    key = jax.random.PRNGKey(0)
    num_classes = 1
    # encoder-style feature pyramid (shallow -> deep), NCHW
    in_channels = (8, 16, 32, 64)
    spatial = (16, 8, 4, 2)
    batch = 2

    keys = jax.random.split(key, 8)
    features = [
        jax.random.normal(keys[i], (batch, in_channels[i], spatial[i], spatial[i]),
                          jnp.float32)
        for i in range(4)
    ]
    # one block per reversed feature channel count (deepest 3)
    blocks_params = [
        init_block_params(keys[4 + i], ch, num_classes)
        for i, ch in enumerate(in_channels[::-1][:3])
    ]

    outs = deep_supervision_head(features, blocks_params, num_classes=num_classes)
    outs = [jax.block_until_ready(o) for o in outs]

    ok = True
    # sanity check against pure-JAX reference (small-HW packed path)
    for idx, feat in enumerate(features[::-1][:3]):
        ref = _reference_block(feat, blocks_params[idx], num_classes)
        ok &= np.allclose(np.asarray(outs[idx]), np.asarray(ref), atol=1e-4, rtol=1e-4)
        ok &= outs[idx].shape == (batch, num_classes, feat.shape[2], feat.shape[3])

    # exercise the large-HW streaming path (f32) and the bf16 path on the same shapes
    big_feat = jax.random.normal(keys[7], (batch, 16, 32, 32), jnp.float32)
    big_params = init_block_params(keys[6], 16, num_classes)
    big_out = jax.block_until_ready(
        ds_block_apply(big_feat, big_params["w1"], big_params["bn_gamma"],
                       big_params["bn_beta"], big_params["bn_mean"], big_params["bn_var"],
                       big_params["w2"], big_params["b2"], num_classes=num_classes))
    big_ref = _reference_block(big_feat, big_params, num_classes)
    ok &= np.allclose(np.asarray(big_out), np.asarray(big_ref), atol=1e-4, rtol=1e-4)

    bf16_out = jax.block_until_ready(
        ds_block_apply(big_feat.astype(jnp.bfloat16), big_params["w1"], big_params["bn_gamma"],
                       big_params["bn_beta"], big_params["bn_mean"], big_params["bn_var"],
                       big_params["w2"], big_params["b2"], num_classes=num_classes))
    ok &= bf16_out.dtype == jnp.bfloat16
    ok &= np.allclose(np.asarray(bf16_out, dtype=np.float32), np.asarray(big_ref),
                      atol=1e-1, rtol=1e-1)

    if ok:
        print("KERNEL_OK")
    else:
        print("KERNEL_MISMATCH")
</pallas_src>

<mosaic_0001>
module attributes {stable_mosaic.version = 11 : i64} {
  func.func @_ds_block_kernel(%arg0: i32, %arg1: i32, %arg2: memref<1x64x8xf32, #tpu.memory_space<vmem>>, %arg3: memref<16x64xf32, #tpu.memory_space<vmem>>, %arg4: memref<16x1xf32, #tpu.memory_space<vmem>>, %arg5: memref<16x1xf32, #tpu.memory_space<vmem>>, %arg6: memref<1x1xf32, #tpu.memory_space<vmem>>, %arg7: memref<1x1x8xf32, #tpu.memory_space<vmem>>) attributes {dimension_semantics = [#tpu.dimension_semantics<parallel>, #tpu.dimension_semantics<parallel>], iteration_bounds = array<i64: 1, 1>, scalar_prefetch = 0 : i64, scratch_operands = 0 : i64, tpu.core_type = #tpu.core_type<tc>, window_params = [{transform_indices = @transform_0, window_bounds = array<i64: 1, 64, 8>}, {pipeline_mode = #tpu.pipeline_mode<synchronous>, transform_indices = @transform_1, window_bounds = array<i64: 16, 64>}, {pipeline_mode = #tpu.pipeline_mode<synchronous>, transform_indices = @transform_2, window_bounds = array<i64: 16, 1>}, {pipeline_mode = #tpu.pipeline_mode<synchronous>, transform_indices = @transform_3, window_bounds = array<i64: 16, 1>}, {pipeline_mode = #tpu.pipeline_mode<synchronous>, transform_indices = @transform_4, window_bounds = array<i64: 1, 1>}, {transform_indices = @transform_5, window_bounds = array<i64: 1, 1, 8>}]} {
    %c0 = arith.constant 0 : index
    %c0_0 = arith.constant 0 : index
    %c0_1 = arith.constant 0 : index
    %0 = vector.load %arg2[%c0, %c0_0, %c0_1] : memref<1x64x8xf32, #tpu.memory_space<vmem>>, vector<1x64x8xf32>
    %1 = vector.shape_cast %0 : vector<1x64x8xf32> to vector<64x8xf32>
    %c0_2 = arith.constant 0 : index
    %c0_3 = arith.constant 0 : index
    %2 = vector.load %arg3[%c0_2, %c0_3] : memref<16x64xf32, #tpu.memory_space<vmem>>, vector<16x64xf32>
    %cst = arith.constant dense<0.000000e+00> : vector<16x8xf32>
    %3 = tpu.matmul %2, %1, %cst {dimension_numbers = #tpu.dot_dimension_numbers<[1], [0], [0], [1], [0, 0, 1, 1], [], []>} : vector<16x64xf32>, vector<64x8xf32>, vector<16x8xf32> -> vector<16x8xf32>
    %c0_4 = arith.constant 0 : index
    %c0_5 = arith.constant 0 : index
    %4 = vector.load %arg4[%c0_4, %c0_5] : memref<16x1xf32, #tpu.memory_space<vmem>>, vector<16x1xf32>
    %5 = vector.broadcast %4 : vector<16x1xf32> to vector<16x8xf32>
    %6 = arith.addf %3, %5 : vector<16x8xf32>
    %cst_6 = arith.constant 0.000000e+00 : f32
    %7 = vector.broadcast %cst_6 : f32 to vector<16x8xf32>
    %8 = arith.maximumf %6, %7 : vector<16x8xf32>
    %c0_7 = arith.constant 0 : index
    %c0_8 = arith.constant 0 : index
    %9 = vector.load %arg5[%c0_7, %c0_8] : memref<16x1xf32, #tpu.memory_space<vmem>>, vector<16x1xf32>
    %10 = vector.broadcast %9 : vector<16x1xf32> to vector<16x8xf32>
    %11 = arith.mulf %8, %10 : vector<16x8xf32>
    %cst_9 = arith.constant dense<0.000000e+00> : vector<8xf32>
    %12 = vector.multi_reduction <add>, %11, %cst_9 [0] : vector<16x8xf32> to vector<8xf32>
    %13 = vector.shape_cast %12 : vector<8xf32> to vector<1x8xf32>
    %c0_10 = arith.constant 0 : index
    %c0_11 = arith.constant 0 : index
    %14 = vector.load %arg6[%c0_10, %c0_11] : memref<1x1xf32, #tpu.memory_space<vmem>>, vector<1x1xf32>
    %15 = vector.broadcast %14 : vector<1x1xf32> to vector<1x8xf32>
    %16 = arith.addf %13, %15 : vector<1x8xf32>
    %c0_12 = arith.constant 0 : index
    %c0_13 = arith.constant 0 : index
    %c0_14 = arith.constant 0 : index
    %17 = vector.load %arg7[%c0_12, %c0_13, %c0_14] : memref<1x1x8xf32, #tpu.memory_space<vmem>>, vector<1x1x8xf32>
    %18 = vector.shape_cast %17 : vector<1x1x8xf32> to vector<1x8xf32>
    %19 = vector.shape_cast %16 : vector<1x8xf32> to vector<1x1x8xf32>
    tpu.vector_store %arg7[%c0_12, %c0_13, %c0_14], %19 {strides = array<i32>} : memref<1x1x8xf32, #tpu.memory_space<vmem>>, vector<1x1x8xf32>,
    return
  }
  func.func @transform_0(%arg0: i32, %arg1: i32) -> (i32, i32, i32) {
    %c0_i32 = arith.constant 0 : i32
    %c0_i32_0 = arith.constant 0 : i32
    return %arg0, %c0_i32, %arg1 : i32, i32, i32
  }
  func.func @transform_1(%arg0: i32, %arg1: i32) -> (i32, i32) {
    %c0_i32 = arith.constant 0 : i32
    %c0_i32_0 = arith.constant 0 : i32
    %c0_i32_1 = arith.constant 0 : i32
    return %c0_i32, %c0_i32_0 : i32, i32
  }
  func.func @transform_2(%arg0: i32, %arg1: i32) -> (i32, i32) {
    %c0_i32 = arith.constant 0 : i32
    %c0_i32_0 = arith.constant 0 : i32
    %c0_i32_1 = arith.constant 0 : i32
    return %c0_i32, %c0_i32_0 : i32, i32
  }
  func.func @transform_3(%arg0: i32, %arg1: i32) -> (i32, i32) {
    %c0_i32 = arith.constant 0 : i32
    %c0_i32_0 = arith.constant 0 : i32
    %c0_i32_1 = arith.constant 0 : i32
    return %c0_i32, %c0_i32_0 : i32, i32
  }
  func.func @transform_4(%arg0: i32, %arg1: i32) -> (i32, i32) {
    %c0_i32 = arith.constant 0 : i32
    %c0_i32_0 = arith.constant 0 : i32
    %c0_i32_1 = arith.constant 0 : i32
    return %c0_i32, %c0_i32_0 : i32, i32
  }
  func.func @transform_5(%arg0: i32, %arg1: i32) -> (i32, i32, i32) {
    %c0_i32 = arith.constant 0 : i32
    %c0_i32_0 = arith.constant 0 : i32
    return %arg0, %c0_i32, %arg1 : i32, i32, i32
  }
}

</mosaic_0001>

<bundles_post_ra>
// kernel: ds_block_apply.1
= control target key start
LH: loop header
LB: loop body
LE: loop exit
PB: predicated region body
PF: predicated region fallthrough
CT: control target
= control target key end

     0   :  { %v128_v2 = vmov 0   ;;  %vm44_vm0 = vcmask 523264   ;;  %vm90_vm1 = vcmask 64512   ;;  %vm108_vm2 = vcmask 57344   ;;  %s207_s0 = inlined_call_operand.vmem [shape: f32[1,64,8], index: 0, kind: input, shape index: {}]   ;;  %s208_s2 = inlined_call_operand.vmem [shape: f32[16,1], index: 2, kind: input, shape index: {}]   ;;  %s209_s3 = inlined_call_operand.vmem [shape: f32[16,1], index: 3, kind: input, shape index: {}]   ;;  %s210_s4 = inlined_call_operand.<no memory space> [shape: f32[1,1], index: 4, kind: input, shape index: {}]   ;;  %s211_s1 = inlined_call_operand.vmem [shape: f32[16,64], index: 1, kind: input, shape index: {}]   ;;  %s212_s5 = inlined_call_operand.vmem [shape: f32[1,1,8], index: 5, kind: output, shape index: {}]  }
   0x1   :  { %v29_v0 = vld [vmem:[%s207_s0 + $0x38] sm:$0xff]  ;;  %v28_v1 = vld [vmem:[%s207_s0 + $0x30] sm:$0xff]  ;;  %125 = vset.pattern.permute.xlu0 %v128_v2  ;;  %126 = vset.pattern.permute.xlu1 %v128_v2  ;;  %v10_v3 = vstv %s210_s4  ;;  %v32_v4 = vld [vmem:[%s208_s2] sm:$0xff] }
   0x2   :  { %59 = vmatpush.msra.mxu0 %v29_v0  ;;  %116 = vmatpush.msra.mxu1 %v29_v0  ;;  %11 = vst [vmem:[#allocation2] sm:$0x1] %v10_v3  ;;  %v27_v5 = vld [vmem:[%s207_s0 + $0x28] sm:$0xff]  ;;  %v76_v6 = vld [vmem:[%s209_s3] sm:$0xff]  ;;  %v25_v8 = vld [vmem:[%s207_s0 + $0x18] sm:$0xff] }
   0x3   :  { %36 = vperm.xlu0 %125, %v32_v4   ;;  %127 = vset.pattern.permute.xlu2 %v128_v2  ;;  %v26_v7 = vld [vmem:[%s207_s0 + $0x20] sm:$0xff]  ;;  %v33_v9 = vld [vmem:[%s208_s2 + $0x8] sm:$0xff]  ;;  %v24_v10 = vld [vmem:[%s207_s0 + $0x10] sm:$0xff] }
   0x4   :  { %60 = vmatpush.msra.mxu0 %v28_v1  ;;  %117 = vmatpush.msra.mxu1 %v28_v1  ;;  %v77_v12 = vld [vmem:[%s209_s3 + $0x8] sm:$0xff]  ;;  %v22_v14 = vld [vmem:[%s207_s0] sm:$0xff] }
   0x5   :  { %80 = vperm.xlu1 %126, %v76_v6   ;;  %v23_v13 = vld [vmem:[%s207_s0 + $0x8] sm:$0xff]  ;;  %v30_v15 = vld [vmem:[%s211_s1] sm:$0xff] }
   0x6   :  { %61 = vmatpush.msra.mxu0 %v27_v5  ;;  %118 = vmatpush.msra.mxu1 %v27_v5  ;;  %v31_v16 = vld [vmem:[%s211_s1 + $0x8] sm:$0xff] }
   0x8   :  { %62 = vmatpush.msra.mxu0 %v26_v7  ;;  %119 = vmatpush.msra.mxu1 %v26_v7 }
   0x9   :  { %v100_v11 = vld [vmem:[#allocation2] sm:$0x1] }
   0xa   :  { %63 = vmatpush.msra.mxu0 %v25_v8  ;;  %120 = vmatpush.msra.mxu1 %v25_v8 }
   0xb   :  { %41 = vperm.xlu0 %125, %v33_v9   ;;  %103 = vperm.xlu2 %127, %v100_v11  }
   0xc   :  { %64 = vmatpush.msra.mxu0 %v24_v10  ;;  %121 = vmatpush.msra.mxu1 %v24_v10 }
   0xd   :  { %85 = vperm.xlu1 %126, %v77_v12  }
   0xe   :  { %65 = vmatpush.msra.mxu0 %v23_v13  ;;  %122 = vmatpush.msra.mxu1 %v23_v13 }
  0x10   :  { %66 = vmatpush.msra.mxu0 %v22_v14  ;;  %123 = vmatpush.msra.mxu1 %v22_v14 }
  0x11   :  { %114 = vmatmul.msk.f32.vlgmr.msra.gmra.mxu0 %vm44_vm0, %v30_v15  ;;  %115 = vmatmul.msk.f32.vlgmr.msra.gmra.mxu1 %vm44_vm0, %v31_v16 }
  0x65   :  { %v104_v35 = vpop.permute.xlu2 %103 }
  0x66   :  { %v106_v38 = vperm.slane %v104_v35, 0 }
  0x75   :  { %v37_v17 = vpop.permute.xlu0 %36 }
  0x77   :  { %v81_v18 = vpop.permute.xlu1 %80 }
  0x7d   :  { %v42_v19 = vpop.permute.xlu0 %41 }
  0x7f   :  { %v86_v26 = vpop.permute.xlu1 %85 }
  0x8e   :  { %v68_v20 = vpop.f32.mrf.mxu0  ;;  %v71_v21 = vpop.f32.mrf.mxu1 }
  0x8f   :  { %v69_v22 = vadd.f32 %v68_v20, %v37_v17  ;;  %v72_v23 = vadd.f32 %v71_v21, %v42_v19 }
  0x91   :  { %v74_v24 = vmax.f32 %v69_v22, 0.0  ;;  %v75_v25 = vmax.f32 %v72_v23, 0.0 }
  0x93   :  { %v88_v27 = vmul.f32 %v81_v18, %v74_v24  ;;  %v89_v28 = vmul.f32 %v86_v26, %v75_v25 }
  0x95   :  { %v91_v29 = vsel %vm90_vm1, %v88_v27, 0.0  ;;  %v92_v30 = vsel %vm90_vm1, %v89_v28, 0.0 }
  0x96   :  { %v93_v31 = vadd.f32 %v92_v30, %v91_v29 }
  0x98   :  { %v94_v32 = vrot.slane %v93_v31, 4 }
  0x9a   :  { %v95_v33 = vadd.f32 %v94_v32, %v93_v31 }
  0x9c   :  { %v96_v34 = vrot.slane %v95_v33, 2 }
  0x9e   :  { %v97_v36 = vadd.f32 %v96_v34, %v95_v33 }
  0xa0   :  { %v98_v37 = vrot.slane %v97_v36, 1 }
  0xa2   :  { %v99_v39 = vadd.f32 %v98_v37, %v97_v36 }
  0xa4   :  { %v107_v40 = vadd.f32 %v106_v38, %v99_v39 }
  0xa6   :  { %109 = vst.msk [vmem:[%s212_s5] sm:$0x1] %vm108_vm2, %v107_v40 }

</bundles_post_ra>
